<compile_context>
chip_gen: v6e
topology: v6e:2x2x1
jax: 0.10.0
libtpu: 0.0.40
codegen_flags: <defaults>
</compile_context>

<pallas_src>
import functools

import jax
import jax.numpy as jnp
from jax.experimental import pallas as pl
from jax.experimental.pallas import tpu as pltpu

LN_EPS = 1e-5


def _round_up(n, m):
    return ((n + m - 1) // m) * m


def _vmem_limit_bytes():
    # ~3/4 of physical VMEM, capped at 100 MiB (v5e/v6e: 128 MiB, v7x: 64 MiB per TC).
    try:
        cap = pltpu.get_tpu_info().vmem_capacity_bytes
        return int(min(cap * 3 // 4, 100 * 1024 * 1024))
    except Exception:
        return 48 * 1024 * 1024


def _resident_spec(shape):
    # Constant-index operand (index_map always (0,0)): single-buffer it so the two
    # weight matrices are not duplicated in VMEM (matters most on v7x's 64 MiB).
    if hasattr(pl, "Buffered"):
        try:
            return pl.BlockSpec(shape, lambda i: (0, 0), pipeline_mode=pl.Buffered(1))
        except Exception:
            pass
    return pl.BlockSpec(shape, lambda i: (0, 0))


def ffn_kernel(x_ref, w1_ref, b1_ref, w2_ref, b2_ref, gamma_ref, beta_ref, o_ref):
    x_in = x_ref[...].astype(jnp.float32)           # (tm, H) f32 for residual / LN
    x_mm = x_in.astype(jnp.bfloat16)                # bf16 MXU operand

    # Hoist small broadcast operands once.
    b1 = b1_ref[...].astype(jnp.float32)            # (1, 4H)
    b2 = b2_ref[...].astype(jnp.float32)            # (1, H)
    gamma = gamma_ref[...].astype(jnp.float32)      # (1, H)
    beta = beta_ref[...].astype(jnp.float32)        # (1, H)

    # conv1 (1x1 conv == linear): bf16 operands, f32 accumulation, then ReLU.
    h = jnp.dot(x_mm, w1_ref[...], preferred_element_type=jnp.float32) + b1
    h = jnp.maximum(h, 0.0).astype(jnp.bfloat16)    # (tm, 4H) bf16 for 2nd MXU pass

    # conv2 + bias + residual fused into one VPU pass (f32).
    r = jnp.dot(h, w2_ref[...], preferred_element_type=jnp.float32) + b2 + x_in

    # LayerNorm over last dim (biased variance, eps=1e-5, affine), f32.
    mean = jnp.mean(r, axis=-1, keepdims=True)
    cent = r - mean
    var = jnp.mean(cent * cent, axis=-1, keepdims=True)
    norm = cent * jax.lax.rsqrt(var + LN_EPS)
    o_ref[...] = (norm * gamma + beta).astype(o_ref.dtype)


@functools.partial(jax.jit, static_argnames=("tm",))
def position_wise_ffn(x, w1, b1, w2, b2, gamma, beta, *, tm=512):
    """x: (B, T, H). w1: (H, 4H), w2: (4H, H), b1/b2/gamma/beta: (1, .).

    Returns (B, T, H) in x.dtype. Matmuls in bf16 with f32 accumulation; LN in f32.
    """
    B, T, H = x.shape
    H4 = w1.shape[1]
    rows = B * T

    # Row tile: multiple of 8 sublanes; 512 is MXU-row aligned on v5e/v6e/v7x.
    # Clamp for tiny inputs, pad ragged row counts with zeros (LN on zero rows is
    # finite and the padded rows are sliced off afterwards).
    tm = min(tm, _round_up(rows, 8))
    rows_pad = _round_up(rows, tm)

    x2d = x.reshape(rows, H)
    if rows_pad != rows:
        x2d = jnp.pad(x2d, ((0, rows_pad - rows), (0, 0)))

    # bf16 weights: halves weight DMA/VMEM bytes and doubles MXU throughput.
    w1_mm = w1.astype(jnp.bfloat16)
    w2_mm = w2.astype(jnp.bfloat16)

    cost = pl.CostEstimate(
        flops=4 * rows_pad * H * H4,           # two matmuls: 2*rows*H*4H each
        transcendentals=rows_pad,              # one rsqrt per row (LayerNorm)
        bytes_accessed=(
            rows_pad * H * x2d.dtype.itemsize          # x in
            + rows_pad * H * x.dtype.itemsize          # out
            + (w1_mm.size + w2_mm.size) * 2            # bf16 weights
            + (b1.size + b2.size + gamma.size + beta.size) * 4
        ),
    )

    # NOTE: for lane-dense (unmasked) output stores, H should be a multiple of 128
    # (true for real BERT H=768; the H=32 toy config below is just a demo).
    out2d = pl.pallas_call(
        ffn_kernel,
        out_shape=jax.ShapeDtypeStruct((rows_pad, H), x.dtype),
        grid_spec=pltpu.PrefetchScalarGridSpec(
            num_scalar_prefetch=0,
            grid=(rows_pad // tm,),
            in_specs=[
                pl.BlockSpec((tm, H), lambda i: (i, 0)),   # x row tile (double-buffered)
                _resident_spec((H, H4)),                   # w1 (single-buffered)
                _resident_spec((1, H4)),                   # b1
                _resident_spec((H4, H)),                   # w2 (single-buffered)
                _resident_spec((1, H)),                    # b2
                _resident_spec((1, H)),                    # gamma
                _resident_spec((1, H)),                    # beta
            ],
            out_specs=pl.BlockSpec((tm, H), lambda i: (i, 0)),
        ),
        compiler_params=pltpu.CompilerParams(
            dimension_semantics=("parallel",),
            vmem_limit_bytes=_vmem_limit_bytes(),
        ),
        cost_estimate=cost,
    )(x2d, w1_mm, b1, w2_mm, b2, gamma, beta)

    if rows_pad != rows:
        out2d = out2d[:rows]
    return out2d.reshape(B, T, H)


def xavier_uniform(key, fan_in, fan_out, shape, gain):
    # matches nn.init.xavier_uniform_ for Conv1d(kernel_size=1)
    bound = gain * jnp.sqrt(6.0 / (fan_in + fan_out))
    return jax.random.uniform(key, shape, jnp.float32, -bound, bound)


def reference(x2d, w1, b1, w2, b2, gamma, beta):
    # Mirrors the kernel numerics: bf16 matmul operands, f32 accumulation, f32 LN.
    xb = x2d.astype(jnp.bfloat16)
    h = jnp.dot(xb, w1.astype(jnp.bfloat16), preferred_element_type=jnp.float32) + b1
    h = jnp.maximum(h, 0.0).astype(jnp.bfloat16)
    r = jnp.dot(h, w2.astype(jnp.bfloat16), preferred_element_type=jnp.float32) + b2 + x2d
    mean = r.mean(-1, keepdims=True)
    var = ((r - mean) ** 2).mean(-1, keepdims=True)
    return (r - mean) * jax.lax.rsqrt(var + LN_EPS) * gamma + beta


if __name__ == "__main__":
    B, T, H = 2, 8, 32          # num_hidden = 32 (toy)
    H4 = 4 * H

    key = jax.random.PRNGKey(0)
    kx, k1, k2, kb1, kb2 = jax.random.split(key, 5)

    x = jax.random.normal(kx, (B, T, H), jnp.float32)

    relu_gain = jnp.sqrt(2.0)   # nn.init.calculate_gain('relu')
    lin_gain = 1.0              # nn.init.calculate_gain('linear')

    # Conv1d weights are (out, in, 1); stored here as the equivalent (in, out) matmul weight.
    w1 = xavier_uniform(k1, H, H4, (H, H4), relu_gain)
    w2 = xavier_uniform(k2, H4, H, (H4, H), lin_gain)
    # Conv1d default bias init: U(-1/sqrt(fan_in), 1/sqrt(fan_in))
    b1 = jax.random.uniform(kb1, (1, H4), jnp.float32,
                            -1.0 / jnp.sqrt(H), 1.0 / jnp.sqrt(H))
    b2 = jax.random.uniform(kb2, (1, H), jnp.float32,
                            -1.0 / jnp.sqrt(H4), 1.0 / jnp.sqrt(H4))
    gamma = jnp.ones((1, H), jnp.float32)
    beta = jnp.zeros((1, H), jnp.float32)

    out = position_wise_ffn(x, w1, b1, w2, b2, gamma, beta)
    out = jax.block_until_ready(out)

    ref = reference(x.reshape(B * T, H), w1, b1, w2, b2, gamma, beta).reshape(B, T, H)
    assert out.shape == (B, T, H)
    assert jnp.allclose(out, ref, atol=1e-3, rtol=1e-3), (
        float(jnp.max(jnp.abs(out - ref))))

    print("KERNEL_OK")
</pallas_src>

<mosaic_0001>
module attributes {stable_mosaic.version = 11 : i64} {
  func.func @ffn_kernel(%arg0: i32, %arg1: memref<16x32xf32, #tpu.memory_space<vmem>>, %arg2: memref<32x128xbf16, #tpu.memory_space<vmem>>, %arg3: memref<1x128xf32, #tpu.memory_space<vmem>>, %arg4: memref<128x32xbf16, #tpu.memory_space<vmem>>, %arg5: memref<1x32xf32, #tpu.memory_space<vmem>>, %arg6: memref<1x32xf32, #tpu.memory_space<vmem>>, %arg7: memref<1x32xf32, #tpu.memory_space<vmem>>, %arg8: memref<16x32xf32, #tpu.memory_space<vmem>>) attributes {dimension_semantics = [#tpu.dimension_semantics<parallel>], iteration_bounds = array<i64: 1>, scalar_prefetch = 0 : i64, scratch_operands = 0 : i64, tpu.core_type = #tpu.core_type<tc>, window_params = [{transform_indices = @transform_0, window_bounds = array<i64: 16, 32>}, {pipeline_mode = #tpu.pipeline_mode<synchronous>, transform_indices = @transform_1, window_bounds = array<i64: 32, 128>}, {pipeline_mode = #tpu.pipeline_mode<synchronous>, transform_indices = @transform_2, window_bounds = array<i64: 1, 128>}, {pipeline_mode = #tpu.pipeline_mode<synchronous>, transform_indices = @transform_3, window_bounds = array<i64: 128, 32>}, {pipeline_mode = #tpu.pipeline_mode<synchronous>, transform_indices = @transform_4, window_bounds = array<i64: 1, 32>}, {pipeline_mode = #tpu.pipeline_mode<synchronous>, transform_indices = @transform_5, window_bounds = array<i64: 1, 32>}, {pipeline_mode = #tpu.pipeline_mode<synchronous>, transform_indices = @transform_6, window_bounds = array<i64: 1, 32>}, {transform_indices = @transform_7, window_bounds = array<i64: 16, 32>}]} {
    %c0 = arith.constant 0 : index
    %c0_0 = arith.constant 0 : index
    %0 = vector.load %arg1[%c0, %c0_0] : memref<16x32xf32, #tpu.memory_space<vmem>>, vector<16x32xf32>
    %1 = arith.truncf %0 : vector<16x32xf32> to vector<16x32xbf16>
    %c0_1 = arith.constant 0 : index
    %c0_2 = arith.constant 0 : index
    %2 = vector.load %arg3[%c0_1, %c0_2] : memref<1x128xf32, #tpu.memory_space<vmem>>, vector<1x128xf32>
    %c0_3 = arith.constant 0 : index
    %c0_4 = arith.constant 0 : index
    %3 = vector.load %arg5[%c0_3, %c0_4] : memref<1x32xf32, #tpu.memory_space<vmem>>, vector<1x32xf32>
    %c0_5 = arith.constant 0 : index
    %c0_6 = arith.constant 0 : index
    %4 = vector.load %arg6[%c0_5, %c0_6] : memref<1x32xf32, #tpu.memory_space<vmem>>, vector<1x32xf32>
    %c0_7 = arith.constant 0 : index
    %c0_8 = arith.constant 0 : index
    %5 = vector.load %arg7[%c0_7, %c0_8] : memref<1x32xf32, #tpu.memory_space<vmem>>, vector<1x32xf32>
    %c0_9 = arith.constant 0 : index
    %c0_10 = arith.constant 0 : index
    %6 = vector.load %arg2[%c0_9, %c0_10] : memref<32x128xbf16, #tpu.memory_space<vmem>>, vector<32x128xbf16>
    %cst = arith.constant dense<0.000000e+00> : vector<16x128xf32>
    %7 = tpu.matmul %1, %6, %cst {dimension_numbers = #tpu.dot_dimension_numbers<[1], [0], [0], [1], [0, 0, 1, 1], [], []>} : vector<16x32xbf16>, vector<32x128xbf16>, vector<16x128xf32> -> vector<16x128xf32>
    %8 = vector.broadcast %2 : vector<1x128xf32> to vector<16x128xf32>
    %9 = arith.addf %7, %8 : vector<16x128xf32>
    %cst_11 = arith.constant 0.000000e+00 : f32
    %10 = vector.broadcast %cst_11 : f32 to vector<16x128xf32>
    %11 = arith.maximumf %9, %10 : vector<16x128xf32>
    %12 = arith.truncf %11 : vector<16x128xf32> to vector<16x128xbf16>
    %c0_12 = arith.constant 0 : index
    %c0_13 = arith.constant 0 : index
    %13 = vector.load %arg4[%c0_12, %c0_13] : memref<128x32xbf16, #tpu.memory_space<vmem>>, vector<128x32xbf16>
    %cst_14 = arith.constant dense<0.000000e+00> : vector<16x32xf32>
    %14 = tpu.matmul %12, %13, %cst_14 {dimension_numbers = #tpu.dot_dimension_numbers<[1], [0], [0], [1], [0, 0, 1, 1], [], []>} : vector<16x128xbf16>, vector<128x32xbf16>, vector<16x32xf32> -> vector<16x32xf32>
    %15 = vector.broadcast %3 : vector<1x32xf32> to vector<16x32xf32>
    %16 = arith.addf %14, %15 : vector<16x32xf32>
    %17 = arith.addf %16, %0 : vector<16x32xf32>
    %cst_15 = arith.constant dense<0.000000e+00> : vector<16xf32>
    %18 = vector.multi_reduction <add>, %17, %cst_15 [1] : vector<16x32xf32> to vector<16xf32>
    %19 = vector.shape_cast %18 : vector<16xf32> to vector<16x1xf32>
    %cst_16 = arith.constant 3.200000e+01 : f32
    %20 = vector.broadcast %cst_16 : f32 to vector<16x1xf32>
    %21 = arith.divf %19, %20 : vector<16x1xf32>
    %22 = vector.broadcast %21 : vector<16x1xf32> to vector<16x32xf32>
    %23 = arith.subf %17, %22 : vector<16x32xf32>
    %24 = arith.mulf %23, %23 : vector<16x32xf32>
    %cst_17 = arith.constant dense<0.000000e+00> : vector<16xf32>
    %25 = vector.multi_reduction <add>, %24, %cst_17 [1] : vector<16x32xf32> to vector<16xf32>
    %26 = vector.shape_cast %25 : vector<16xf32> to vector<16x1xf32>
    %cst_18 = arith.constant 3.200000e+01 : f32
    %27 = vector.broadcast %cst_18 : f32 to vector<16x1xf32>
    %28 = arith.divf %26, %27 : vector<16x1xf32>
    %cst_19 = arith.constant 9.99999974E-6 : f32
    %29 = vector.broadcast %cst_19 : f32 to vector<16x1xf32>
    %30 = arith.addf %28, %29 : vector<16x1xf32>
    %31 = math.rsqrt %30 : vector<16x1xf32>
    %32 = vector.broadcast %31 : vector<16x1xf32> to vector<16x32xf32>
    %33 = arith.mulf %23, %32 : vector<16x32xf32>
    %34 = vector.broadcast %4 : vector<1x32xf32> to vector<16x32xf32>
    %35 = arith.mulf %33, %34 : vector<16x32xf32>
    %36 = vector.broadcast %5 : vector<1x32xf32> to vector<16x32xf32>
    %37 = arith.addf %35, %36 : vector<16x32xf32>
    %c0_20 = arith.constant 0 : index
    %c0_21 = arith.constant 0 : index
    %38 = vector.load %arg8[%c0_20, %c0_21] : memref<16x32xf32, #tpu.memory_space<vmem>>, vector<16x32xf32>
    tpu.vector_store %arg8[%c0_20, %c0_21], %37 {strides = array<i32>} : memref<16x32xf32, #tpu.memory_space<vmem>>, vector<16x32xf32>,
    return
  }
  func.func @transform_0(%arg0: i32) -> (i32, i32) {
    %c0_i32 = arith.constant 0 : i32
    %c0_i32_0 = arith.constant 0 : i32
    return %arg0, %c0_i32 : i32, i32
  }
  func.func @transform_1(%arg0: i32) -> (i32, i32) {
    %c0_i32 = arith.constant 0 : i32
    %c0_i32_0 = arith.constant 0 : i32
    %c0_i32_1 = arith.constant 0 : i32
    return %c0_i32, %c0_i32_0 : i32, i32
  }
  func.func @transform_2(%arg0: i32) -> (i32, i32) {
    %c0_i32 = arith.constant 0 : i32
    %c0_i32_0 = arith.constant 0 : i32
    %c0_i32_1 = arith.constant 0 : i32
    return %c0_i32, %c0_i32_0 : i32, i32
  }
  func.func @transform_3(%arg0: i32) -> (i32, i32) {
    %c0_i32 = arith.constant 0 : i32
    %c0_i32_0 = arith.constant 0 : i32
    %c0_i32_1 = arith.constant 0 : i32
    return %c0_i32, %c0_i32_0 : i32, i32
  }
  func.func @transform_4(%arg0: i32) -> (i32, i32) {
    %c0_i32 = arith.constant 0 : i32
    %c0_i32_0 = arith.constant 0 : i32
    %c0_i32_1 = arith.constant 0 : i32
    return %c0_i32, %c0_i32_0 : i32, i32
  }
  func.func @transform_5(%arg0: i32) -> (i32, i32) {
    %c0_i32 = arith.constant 0 : i32
    %c0_i32_0 = arith.constant 0 : i32
    %c0_i32_1 = arith.constant 0 : i32
    return %c0_i32, %c0_i32_0 : i32, i32
  }
  func.func @transform_6(%arg0: i32) -> (i32, i32) {
    %c0_i32 = arith.constant 0 : i32
    %c0_i32_0 = arith.constant 0 : i32
    %c0_i32_1 = arith.constant 0 : i32
    return %c0_i32, %c0_i32_0 : i32, i32
  }
  func.func @transform_7(%arg0: i32) -> (i32, i32) {
    %c0_i32 = arith.constant 0 : i32
    %c0_i32_0 = arith.constant 0 : i32
    return %arg0, %c0_i32 : i32, i32
  }
}

</mosaic_0001>

<bundles_post_ra>
// kernel: position_wise_ffn.1
= control target key start
LH: loop header
LB: loop body
LE: loop exit
PB: predicated region body
PF: predicated region fallthrough
CT: control target
= control target key end

     0   :  { %v375_v1 = vmov 0.0   ;;  %vm376_vm0 = vmmov 0   ;;  %vm57_vm1 = vcmask 261120   ;;  %s478_s0 = inlined_call_operand.vmem [shape: f32[16,32], index: 0, kind: input, shape index: {}]   ;;  %s479_s1 = inlined_call_operand.vmem [shape: bf16[32,128], index: 1, kind: input, shape index: {}]   ;;  %s480_s2 = inlined_call_operand.vmem [shape: f32[1,128], index: 2, kind: input, shape index: {}]   ;;  %s481_s3 = inlined_call_operand.vmem [shape: bf16[128,32], index: 3, kind: input, shape index: {}]   ;;  %s482_s4 = inlined_call_operand.vmem [shape: f32[1,32], index: 4, kind: input, shape index: {}]   ;;  %s483_s5 = inlined_call_operand.vmem [shape: f32[1,32], index: 5, kind: input, shape index: {}]   ;;  %s484_s6 = inlined_call_operand.vmem [shape: f32[1,32], index: 6, kind: input, shape index: {}]   ;;  %s485_s7 = inlined_call_operand.hbm [shape: f32[16,32], index: 7, kind: output, shape index: {}]  }
   0x1   :  { %v339_v0 = vld [vmem:[%s479_s1 + $0x8] sm:$0xff]   ;;  %306 = vmatprep.subr.bf16.mxu0 %v375_v1  ;;  %v340_v2 = vld [vmem:[%s479_s1] sm:$0xff]   ;;  %314 = vmatprep.subr.bf16.mxu1 %v375_v1  ;;  %v341_v5 = vld [vmem:[%s481_s3 + $0x38] sm:$0xff]  }
   0x2   :  { %307 = vmatpush3.bf16.msra.mxu0 %v339_v0  ;;  %310 = vmatprep.mubr.msk.bf16.mxu0 %vm376_vm0, %v375_v1  ;;  %v28_v3 = vld [vmem:[%s478_s0] sm:$0xff]  ;;  %v29_v4 = vld [vmem:[%s478_s0 + $0x8] sm:$0xff]  ;;  %v342_v7 = vld [vmem:[%s481_s3 + $0x30] sm:$0xff]  }
   0x3   :  { %308 = vmatprep.subr.bf16.mxu0 %v375_v1  ;;  %330 = vmatprep.mubr.msk.bf16.mxu1 %vm376_vm0, %v375_v1  ;;  %v30_v6 = vpack.c.bf16 %v29_v4, %v28_v3  ;;  %v343_v8 = vld [vmem:[%s481_s3 + $0x28] sm:$0xff]  }
   0x4   :  { %315 = vmatpush3.bf16.msra.mxu1 %v341_v5 }
   0x5   :  { %316 = vmatprep.subr.bf16.mxu1 %v375_v1 }
   0x6   :  { %309 = vmatpush3.bf16.msra.mxu0 %v340_v2 }
   0x8   :  { %317 = vmatpush3.bf16.msra.mxu1 %v342_v7 }
   0x9   :  { %311 = vmatmul.mubr.msk.bf16.vlgmr.msra.gmra.mxu0 %vm57_vm1, %v30_v6  ;;  %318 = vmatprep.subr.bf16.mxu1 %v375_v1 }
   0xa   :  { %12 = vsyncpa [#allocation3], 0  ;;  %v344_v9 = vld [vmem:[%s481_s3 + $0x20] sm:$0xff]   ;;  %v345_v10 = vld [vmem:[%s481_s3 + $0x18] sm:$0xff]   ;;  %s377_s28 = smov [#allocation2]  }
   0xb   :  { %v346_v11 = vld [vmem:[%s481_s3 + $0x10] sm:$0xff]   ;;  %v347_v12 = vld [vmem:[%s481_s3 + $0x8] sm:$0xff]   ;;  %v348_v13 = vld [vmem:[%s481_s3] sm:$0xff]   ;;  %s268_s29 = sshll.u32 %s377_s28, 4  ;;  %s269_s29 = int_to_ptr.vmem [resolvable:$true] %s268_s29 }
   0xc   :  { %319 = vmatpush3.bf16.msra.mxu1 %v343_v8  ;;  %v279_v14 = vld [vmem:[%s480_s2] ss:$0 sm:$0xff]  ;;  %s353_s30 = scalar_lea.vmem %s269_s29, 256  ;;  %p358_p1 = scmp.lt.s32.totalorder %s269_s29, %s269_s29 }
   0xd   :  { %320 = vmatprep.subr.bf16.mxu1 %v375_v1  ;;  %v283_v24 = vld [vmem:[%s482_s4] ss:$0 sm:$0xff]  ;;  %p354_p0 = scmp.ne.s32.totalorder %s269_s29, %s353_s30  ;;  %p359_p2 = scmp.lt.s32.totalorder %s353_s30, %s353_s30 }
   0xe   :  { %v292_v52 = vld [vmem:[%s483_s5] ss:$0 sm:$0xff] }
   0xf   :  { %v293_v54 = vld [vmem:[%s484_s6] ss:$0 sm:$0xff]  ;;  %p360_p3 = por %p359_p2, %p358_p1 }
  0x10   :  { %321 = vmatpush3.bf16.msra.mxu1 %v344_v9 }
  0x11   :  { %322 = vmatprep.subr.bf16.mxu1 %v375_v1  ;;  %p361_p4 = pnand %p360_p3, %p354_p0 }
  0x14   :  { %323 = vmatpush3.bf16.msra.mxu1 %v345_v10 }
  0x15   :  { %324 = vmatprep.subr.bf16.mxu1 %v375_v1 }
  0x18   :  { %325 = vmatpush3.bf16.msra.mxu1 %v346_v11 }
  0x19   :  { %326 = vmatprep.subr.bf16.mxu1 %v375_v1 }
  0x1c   :  { %327 = vmatpush3.bf16.msra.mxu1 %v347_v12 }
  0x1d   :  { %328 = vmatprep.subr.bf16.mxu1 %v375_v1 }
  0x20   :  { %329 = vmatpush3.bf16.msra.mxu1 %v348_v13 }
  0xc9   :  { %v95_v15 = vpop.f32.mrf.mxu0 }
  0xca   :  { %v96_v17 = vadd.f32 %v279_v14, %v95_v15 }
  0xcb   :  { %v312_v16 = vpop.f32.mrf.mxu0 }
  0xcc   :  { %v102_v21 = vmax.f32 %v96_v17, 0.0 }
  0xcd   :  { %v98_v18 = vpop.f32.mrf.mxu0 }
  0xce   :  { %v99_v19 = vadd.f32 %v279_v14, %v98_v18 }
  0xcf   :  { %v313_v20 = vpop.f32.mrf.mxu0 }
  0xd0   :  { %v103_v22 = vmax.f32 %v99_v19, 0.0 }
  0xd2   :  { %v104_v23 = vpack.c.bf16 %v103_v22, %v102_v21 }
  0xd4   :  { %331 = vmatmul.mubr.bf16.vlgmr.msra.gmra.mxu1 %v104_v23 }
 0x194   :  { %v209_v25 = vpop.f32.mrf.mxu1 }
 0x195   :  { %v210_v26 = vadd.f32 %v283_v24, %v209_v25 }
 0x196   :  { %v332_v27 = vpop.f32.mrf.mxu1 }
 0x197   :  { %v216_v28 = vadd.f32 %v210_v26, %v28_v3 }
 0x198   :  { %v212_v29 = vpop.f32.mrf.mxu1 }
 0x199   :  { %v213_v30 = vadd.f32 %v283_v24, %v212_v29  ;;  %v218_v31 = vsel %vm57_vm1, %v216_v28, 0.0 }
 0x19a   :  { %219 = vadd.xlane.f32.xlu0 %v218_v31  ;;  %v333_v32 = vpop.f32.mrf.mxu1 }
 0x19b   :  { %v217_v33 = vadd.f32 %v213_v30, %v29_v4 }
 0x19d   :  { %v221_v34 = vsel %vm57_vm1, %v217_v33, 0.0 }
 0x19e   :  { %222 = vadd.xlane.f32.xlu0 %v221_v34 }
 0x223   :  { %v220_v35 = vpop.xlane.xlu0 %219 }
 0x224   :  { %v225_v36 = vmul.f32 0.03125, %v220_v35 }
 0x226   :  { %v227_v37 = vsub.f32 %v216_v28, %v225_v36 }
 0x227   :  { %v223_v38 = vpop.xlane.xlu0 %222 }
 0x228   :  { %v226_v39 = vmul.f32 0.03125, %v223_v38  ;;  %v229_v40 = vmul.f32 %v227_v37, %v227_v37 }
 0x22a   :  { %v228_v41 = vsub.f32 %v217_v33, %v226_v39  ;;  %v231_v42 = vsel %vm57_vm1, %v229_v40, 0.0 }
 0x22b   :  { %232 = vadd.xlane.f32.xlu1 %v231_v42 }
 0x22c   :  { %v230_v43 = vmul.f32 %v228_v41, %v228_v41 }
 0x22e   :  { %v234_v44 = vsel %vm57_vm1, %v230_v43, 0.0 }
 0x22f   :  { %235 = vadd.xlane.f32.xlu1 %v234_v44 }
 0x2b4   :  { %v233_v45 = vpop.xlane.xlu1 %232 }
 0x2b5   :  { %v237_v46 = vmul.f32 0.03125, %v233_v45 }
 0x2b7   :  { %v239_v47 = vadd.f32 1e-05, %v237_v46 }
 0x2b8   :  { %v236_v48 = vpop.xlane.xlu1 %235 }
 0x2b9   :  { %349 = vrsqrt.f32 %v239_v47  ;;  %v238_v49 = vmul.f32 0.03125, %v236_v48 }
 0x2bb   :  { %v240_v50 = vadd.f32 1e-05, %v238_v49 }
 0x2bd   :  { %351 = vrsqrt.f32 %v240_v50 }
 0x2c6   :  { %v350_v51 = vpop.eup %349 }
 0x2c7   :  { %v243_v53 = vmul.f32 %v350_v51, %v227_v37 }
 0x2c9   :  { %v251_v55 = vmul.f32 %v292_v52, %v243_v53 }
 0x2ca   :  { %v352_v56 = vpop.eup %351 }
 0x2cb   :  { %v244_v57 = vmul.f32 %v352_v56, %v228_v41  ;;  %v259_v58 = vadd.f32 %v293_v54, %v251_v55 }
 0x2cd   :  { %v252_v59 = vmul.f32 %v292_v52, %v244_v57  ;;  %261 = vst.msk [vmem:[#allocation2] sm:$0xff] %vm57_vm1, %v259_v58 }
 0x2cf   :  { %v260_v60 = vadd.f32 %v293_v54, %v252_v59 }
 0x2d1   :  { %262 = vst.msk [vmem:[#allocation2 + $0x8] sm:$0xff] %vm57_vm1, %v260_v60 }
 0x2d2   :  { %364 = shalt.err (!%p361_p4)
}
 0x2d3   :  { %s378_s5 = smov 128   ;;  %s379_s6 = smov 8  }
 0x2d4   :  { %274 = dma.vmem_to_hbm [thread:$0]  %s269_s29, 256, %s485_s7, [#allocation3], %s378_s5, %s378_s5, %s379_s6  }
 0x2d5   :  { %373 = dma.done.wait [#allocation3], 256  }
 0x2d6   :  { %374 = vsyncadd [#allocation3], 4294967040 }
 0x2d7   :  { %278 = vsyncpa [#allocation3], 1 }

</bundles_post_ra>
